<compile_context>
chip_gen: v5e
topology: v5e:2x2
jax: 0.10.0
libtpu: 0.0.40
codegen_flags: <defaults>
</compile_context>

<pallas_src>
import functools

import jax
import jax.numpy as jnp
from jax import lax
from jax.experimental import pallas as pl
from jax.experimental.pallas import tpu as pltpu

LANE = 128
SUBLANE = 8
BM_MAX = 2048  # rows per block: 2048*128*4B = 1 MiB f32 tile (2 MiB double-buffered)


def _huber_partial_kernel(delta_ref, x_ref, out_ref, *, bm, total, needs_mask):
    # delta_ref: SMEM (1, 1) f32 scalar
    # x_ref:     VMEM (bm, 128) tile in the input's native dtype
    # out_ref:   VMEM (8, 128) f32 per-block partial sums
    delta = delta_ref[0, 0]
    x = x_ref[...].astype(jnp.float32)
    n = jnp.abs(x)
    l = jnp.where(n < delta, 0.5 * n * n, n * delta - 0.5 * delta * delta)

    if needs_mask:
        # Mask out-of-range elements (tail of a partial block and/or the
        # <128-element lane padding) by flat element index.
        i = pl.program_id(0)
        row = lax.broadcasted_iota(jnp.int32, (bm, LANE), 0)
        col = lax.broadcasted_iota(jnp.int32, (bm, LANE), 1)
        flat = (i * bm + row) * LANE + col
        l = jnp.where(flat < total, l, jnp.float32(0.0))

    # Reduce only the row axis, in (8, 128) vreg-sized chunks -> pure VPU adds.
    out_ref[...] = l.reshape(bm // SUBLANE, SUBLANE, LANE).sum(axis=0)


def huber_func(x, delta, reduction=None):
    """Pallas equivalent of HuberFunc(reduction).forward(x, delta)."""
    total = x.size
    padded = pl.cdiv(total, LANE) * LANE

    xf = x.reshape(-1)
    if padded != total:
        # Only hit when total % 128 != 0; padded values are masked in-kernel.
        xf = jnp.pad(xf, (0, padded - total))
    xf = xf.reshape(-1, LANE)
    rows = xf.shape[0]

    bm = min(BM_MAX, pl.cdiv(rows, SUBLANE) * SUBLANE)
    grid = pl.cdiv(rows, bm)
    needs_mask = (grid * bm != rows) or (padded != total)

    delta_arr = jnp.full((1, 1), delta, dtype=jnp.float32)

    kernel = functools.partial(
        _huber_partial_kernel, bm=bm, total=total, needs_mask=needs_mask)

    partials = pl.pallas_call(
        kernel,
        out_shape=jax.ShapeDtypeStruct((grid * SUBLANE, LANE), jnp.float32),
        grid=(grid,),
        in_specs=[
            pl.BlockSpec(memory_space=pltpu.SMEM),          # delta scalar
            pl.BlockSpec((bm, LANE), lambda i: (i, 0)),      # x tile (native dtype)
        ],
        out_specs=pl.BlockSpec((SUBLANE, LANE), lambda i: (i, 0)),
        compiler_params=pltpu.CompilerParams(
            dimension_semantics=("parallel",)),
    )(delta_arr, xf)

    total_sum = jnp.sum(partials)  # tiny final cross-lane reduce in plain JAX

    if reduction is None or reduction == "mean":
        return total_sum / jnp.float32(total)
    else:
        return total_sum


def _huber_ref(x, delta, reduction=None):
    # Pure-JAX reference mirroring the PyTorch module.
    n = jnp.abs(x.astype(jnp.float32))
    l = jnp.where(n < delta, 0.5 * n ** 2, n * delta - 0.5 * delta ** 2)
    if reduction is None or reduction == "mean":
        return jnp.mean(l)
    return jnp.sum(l)


if __name__ == "__main__":
    key = jax.random.PRNGKey(0)
    x = jax.random.normal(key, (2, 4, 16, 16), dtype=jnp.float32)
    delta = 0.5

    out_mean = huber_func(x, delta, reduction=None)
    out_sum = huber_func(x, delta, reduction="sum")
    jax.block_until_ready(out_mean)
    jax.block_until_ready(out_sum)

    ref_mean = _huber_ref(x, delta, reduction=None)
    ref_sum = _huber_ref(x, delta, reduction="sum")

    assert jnp.allclose(out_mean, ref_mean, rtol=1e-5, atol=1e-6), (out_mean, ref_mean)
    assert jnp.allclose(out_sum, ref_sum, rtol=1e-5, atol=1e-5), (out_sum, ref_sum)

    # Also exercise the masked-tail path with a non-multiple-of-(8*128) size.
    x2 = jax.random.normal(jax.random.PRNGKey(1), (3, 5, 7, 11), dtype=jnp.float32)
    out2 = huber_func(x2, 0.25, reduction=None)
    jax.block_until_ready(out2)
    assert jnp.allclose(out2, _huber_ref(x2, 0.25), rtol=1e-5, atol=1e-6), out2

    print("KERNEL_OK")
</pallas_src>

<mosaic_0001>
module attributes {stable_mosaic.version = 11 : i64} {
  func.func @_huber_partial_kernel(%arg0: i32, %arg1: memref<1x1xf32, #tpu.memory_space<smem>>, %arg2: memref<16x128xf32, #tpu.memory_space<vmem>>, %arg3: memref<8x128xf32, #tpu.memory_space<vmem>>) attributes {dimension_semantics = [#tpu.dimension_semantics<parallel>], iteration_bounds = array<i64: 1>, scalar_prefetch = 0 : i64, scratch_operands = 0 : i64, tpu.core_type = #tpu.core_type<tc>, window_params = [{transform_indices = @transform_0, window_bounds = array<i64: 1, 1>}, {transform_indices = @transform_1, window_bounds = array<i64: 16, 128>}, {transform_indices = @transform_2, window_bounds = array<i64: 8, 128>}]} {
    %c0 = arith.constant 0 : index
    %c0_0 = arith.constant 0 : index
    %0 = memref.load %arg1[%c0, %c0_0] : memref<1x1xf32, #tpu.memory_space<smem>>
    %c0_1 = arith.constant 0 : index
    %c0_2 = arith.constant 0 : index
    %1 = vector.load %arg2[%c0_1, %c0_2] : memref<16x128xf32, #tpu.memory_space<vmem>>, vector<16x128xf32>
    %2 = math.absf %1 : vector<16x128xf32>
    %3 = vector.broadcast %0 : f32 to vector<16x128xf32>
    %4 = arith.cmpf olt, %2, %3 : vector<16x128xf32>
    %cst = arith.constant 5.000000e-01 : f32
    %5 = vector.broadcast %cst : f32 to vector<16x128xf32>
    %6 = arith.mulf %5, %2 : vector<16x128xf32>
    %7 = arith.mulf %6, %2 : vector<16x128xf32>
    %8 = vector.broadcast %0 : f32 to vector<16x128xf32>
    %9 = arith.mulf %2, %8 : vector<16x128xf32>
    %cst_3 = arith.constant 5.000000e-01 : f32
    %10 = arith.mulf %cst_3, %0 : f32
    %11 = arith.mulf %10, %0 : f32
    %12 = vector.broadcast %11 : f32 to vector<16x128xf32>
    %13 = arith.subf %9, %12 : vector<16x128xf32>
    %14 = arith.select %4, %7, %13 : vector<16x128xi1>, vector<16x128xf32>
    %15 = vector.shape_cast %14 : vector<16x128xf32> to vector<2x8x128xf32>
    %cst_4 = arith.constant dense<0.000000e+00> : vector<8x128xf32>
    %16 = vector.multi_reduction <add>, %15, %cst_4 [0] : vector<2x8x128xf32> to vector<8x128xf32>
    %c0_5 = arith.constant 0 : index
    %c0_6 = arith.constant 0 : index
    %17 = vector.load %arg3[%c0_5, %c0_6] : memref<8x128xf32, #tpu.memory_space<vmem>>, vector<8x128xf32>
    tpu.vector_store %arg3[%c0_5, %c0_6], %16 {strides = array<i32>} : memref<8x128xf32, #tpu.memory_space<vmem>>, vector<8x128xf32>,
    return
  }
  func.func @transform_0(%arg0: i32) -> (i32, i32) {
    %c0_i32 = arith.constant 0 : i32
    %c0_i32_0 = arith.constant 0 : i32
    %c0_i32_1 = arith.constant 0 : i32
    return %c0_i32, %c0_i32_0 : i32, i32
  }
  func.func @transform_1(%arg0: i32) -> (i32, i32) {
    %c0_i32 = arith.constant 0 : i32
    %c0_i32_0 = arith.constant 0 : i32
    return %arg0, %c0_i32 : i32, i32
  }
  func.func @transform_2(%arg0: i32) -> (i32, i32) {
    %c0_i32 = arith.constant 0 : i32
    %c0_i32_0 = arith.constant 0 : i32
    return %arg0, %c0_i32 : i32, i32
  }
}

</mosaic_0001>

<bundles_post_ra>
// kernel: tpu_custom_call.1
= control target key start
LH: loop header
LB: loop body
LE: loop exit
PB: predicated region body
PF: predicated region fallthrough
CT: control target
= control target key end

     0   :  { %8 = vsyncpa [#allocation4], 0  ;;  %s159_s0 = inlined_call_operand.<no memory space> [shape: f32[1,1], index: 0, kind: input, shape index: {}]   ;;  %s160_s1 = inlined_call_operand.hbm [shape: f32[16,128], index: 1, kind: input, shape index: {}]   ;;  %s161_s2 = inlined_call_operand.hbm [shape: f32[8,128], index: 2, kind: output, shape index: {}]  }
   0x1   :  { %9 = vsyncpa [#allocation5], 0  ;;  %s16_s11 = sshll.u32 %s160_s1, 4  ;;  %s125_s12 = smov [#allocation3]   ;;  %s17_s11 = int_to_ptr.hbm [resolvable:$true] %s16_s11 }
   0x2   :  { %s18_s13 = sshll.u32 %s125_s12, 4  ;;  %s126_s14 = smov 128   ;;  %s19_s13 = int_to_ptr.vmem [resolvable:$true] %s18_s13 }
   0x3   :  { %s127_s15 = smov 8  }
   0x4   :  { %24 = dma.hbm_to_vmem [thread:$0]  %s17_s11, 256, %s19_s13, [#allocation4], %s126_s14, %s126_s14, %s127_s15  }
   0x5   :  { %121 = dma.done.wait [#allocation4], 256  }
   0x6   :  { %122 = vsyncadd [#allocation4], 4294967040  ;;  %s43_s18 = smul.f32 0.5, %s159_s0  ;;  %v30_v0 = vld [vmem:[#allocation3] sm:$0xff]  ;;  %v31_v1 = vld [vmem:[#allocation3 + $0x8] sm:$0xff]  ;;  %v34_v4 = vstv %s159_s0  ;;  %s128_s23 = smov [#allocation6]  }
   0x7   :  { %v32_v2 = vand.u32 2147483647, %v30_v0  ;;  %v33_v3 = vand.u32 2147483647, %v31_v1  ;;  %s57_s24 = sshll.u32 %s128_s23, 4  ;;  %s59_s27 = sshll.u32 %s161_s2, 4  ;;  %s58_s24 = int_to_ptr.vmem [resolvable:$true] %s57_s24  ;;  %s60_s27 = int_to_ptr.hbm [resolvable:$true] %s59_s27 }
   0x8   :  { %s44_s21 = smul.f32 %s43_s18, %s159_s0 }
   0x9   :  { %v37_v5 = vmul.f32 0.5, %v32_v2  ;;  %v38_v6 = vmul.f32 0.5, %v33_v3  ;;  %v41_v8 = vmul.f32 %v34_v4, %v32_v2  ;;  %v42_v9 = vmul.f32 %v34_v4, %v33_v3 }
   0xa   :  { %v45_v7 = vstv %s44_s21  ;;  %vm35_vm0 = vcmp.lt.f32.partialorder %v32_v2, %v34_v4  ;;  %vm36_vm1 = vcmp.lt.f32.partialorder %v33_v3, %v34_v4 }
   0xb   :  { %v39_v10 = vmul.f32 %v37_v5, %v32_v2  ;;  %v40_v11 = vmul.f32 %v38_v6, %v33_v3  ;;  %v46_v12 = vsub.f32 %v41_v8, %v45_v7  ;;  %v47_v13 = vsub.f32 %v42_v9, %v45_v7 }
   0xd   :  { %v48_v14 = vsel %vm35_vm0, %v39_v10, %v46_v12  ;;  %v49_v15 = vsel %vm36_vm1, %v40_v11, %v47_v13 }
   0xe   :  { %v50_v16 = vadd.f32 %v49_v15, %v48_v14 }
  0x10   :  { %51 = vst [vmem:[#allocation6] sm:$0xff] %v50_v16 }
  0x11   :  { %62 = dma.vmem_to_hbm [thread:$0]  %s58_s24, 128, %s60_s27, [#allocation5]  }
  0x12   :  { %123 = dma.done.wait [#allocation5], 128  }
  0x13   :  { %124 = vsyncadd [#allocation5], 4294967168 }
  0x14   :  { %67 = vsyncpa [#allocation4], 1 }
  0x15   :  { %68 = vsyncpa [#allocation5], 1 }

</bundles_post_ra>
